<compile_context>
chip_gen: v7x
topology: tpu7x:2x2x1
jax: 0.10.0
libtpu: 0.0.40
codegen_flags: <defaults>
</compile_context>

<pallas_src>
import functools

import jax
import jax.numpy as jnp
from jax.experimental import pallas as pl
from jax.experimental.pallas import tpu as pltpu


def fcbert_head_kernel(cls_ref, gt_ref, wp_ref, bp_ref, w1_ref, b1_ref,
                       out_ref):
    """One batch tile: pooler -> classifier -> (log)softmax stats -> NLL.

    Outputs are packed lane-dense into out_ref of shape (3, bt):
      row 0: per-example NLL, row 1: max softmax prob, row 2: argmax as f32.
    """
    cls_h = cls_ref[...]                                            # (bt, H)

    # Bert pooler: tanh(cls @ Wp + bp); MXU matmul with f32 accumulation,
    # tanh computed in f32 (safe on v5e's no-bf16 EUP).
    pooler = jnp.tanh(
        jnp.dot(cls_h, wp_ref[...], preferred_element_type=jnp.float32)
        + bp_ref[...])                                              # (bt, H) f32

    # Classification head: Y1 = pooler @ W1 + b1 (W1/b1 lane-padded to Lp).
    y1 = jnp.dot(pooler.astype(w1_ref.dtype), w1_ref[...],
                 preferred_element_type=jnp.float32) + b1_ref[...]  # (bt, Lp)

    # Shared softmax statistics (padded lanes carry -1e30 -> exp == 0).
    m = jnp.max(y1, axis=1, keepdims=True)                          # (bt, 1)
    z = y1 - m                                                      # (bt, Lp)
    s = jnp.sum(jnp.exp(z), axis=1)                                 # (bt,)
    log_s = jnp.log(s)                                              # (bt,)

    # max(softmax) = 1/s ; argmax(softmax) = argmax(y1) (first occurrence).
    probs = pl.reciprocal(s, approx=True)                           # (bt,)
    num_lanes = y1.shape[1]
    lane_idx = jax.lax.broadcasted_iota(jnp.int32, y1.shape, 1)     # (bt, Lp)
    preds = jnp.min(jnp.where(y1 >= m, lane_idx, num_lanes), axis=1)  # (bt,)

    # NLLLoss per example: -(log_softmax at gt) = log(s) - z[gt].
    gt = gt_ref[...]                                                # (bt, 1) int32
    z_gt = jnp.sum(jnp.where(lane_idx == gt, z, 0.0), axis=1)       # (bt,)
    nll = log_s - z_gt                                              # (bt,)

    # Single lane-dense packed store (one unmasked output DMA per step).
    out_ref[0, :] = nll
    out_ref[1, :] = probs
    out_ref[2, :] = preds.astype(jnp.float32)   # small ints: exact in f32


def _default_batch_tile(B):
    """Pick a batch tile.

    Small batches: one grid step (fills the MXU M dim, no per-step overhead).
    Large batches: a multiple of 256 (v6e/v7x MXU M dim) that keeps >=2 grid
    steps so dimension_semantics=("parallel",) can shard the batch across the
    two v7x TensorCores.
    """
    if B <= 1024:
        return B
    for bt in (1024, 512, 256, 128):
        if B % bt == 0 and B // bt >= 2:
            return bt
    return B


def fcbert_forward(cls_hidden, w_pool, b_pool, w1, b1, ground_truth,
                   *, batch_tile=None):
    """Wrapper: tiling over batch; mean-of-NLL finished in plain JAX."""
    B, H = cls_hidden.shape
    L = w1.shape[1]

    bt = _default_batch_tile(B) if batch_tile is None else min(batch_tile, B)
    assert B % bt == 0, "batch must be divisible by batch_tile"
    if bt != B:
        # Packed output puts the batch tile on the lane axis.
        assert bt % 128 == 0, "partial batch tiles must be multiples of 128"
    num_tiles = pl.cdiv(B, bt)

    gt_col = ground_truth.reshape(B, 1).astype(jnp.int32)

    # Lane-pad the classifier so y1 / softmax / argmax vregs are lane-dense.
    # Zero weight columns + (-1e30) bias => padded logits never matter.
    Lp = ((L + 127) // 128) * 128
    if Lp != L:
        w1p = jnp.zeros((H, Lp), w1.dtype).at[:, :L].set(w1)
        b1p = jnp.full((Lp,), -1e30, jnp.float32).at[:L].set(
            b1.astype(jnp.float32))
    else:
        w1p = w1
        b1p = b1.astype(jnp.float32)
    bp = b_pool.reshape(1, H).astype(jnp.float32)
    b1p = b1p.reshape(1, Lp)

    # Explicit VMEM budget (v7x-safe: capped at 64 MiB).
    act_bytes = cls_hidden.dtype.itemsize
    w_bytes = w1p.dtype.itemsize
    est = (2 * bt * H * act_bytes                   # double-buffered cls tiles
           + 2 * bt * 4                             # double-buffered gt tiles
           + (H * H + H * Lp) * w_bytes             # single-buffered weights
           + (H + Lp) * 4                           # biases (f32)
           + 2 * bt * (H + Lp) * 4                  # f32 intermediates
           + 2 * 3 * bt * 4)                        # packed output (dbl-buf)
    vmem_limit = int(min(64 << 20, max(2 * est, 4 << 20)))

    const_map = lambda i: (0, 0)
    packed = pl.pallas_call(
        fcbert_head_kernel,
        out_shape=jax.ShapeDtypeStruct((3, B), jnp.float32),
        grid=(num_tiles,),
        in_specs=[
            pl.BlockSpec((bt, H), lambda i: (i, 0)),     # cls hidden tile
            pl.BlockSpec((bt, 1), lambda i: (i, 0)),     # ground truth tile
            # Resident weights/biases: constant index_map, single-buffered.
            pl.BlockSpec((H, H), const_map, pipeline_mode=pl.Buffered(1)),
            pl.BlockSpec((1, H), const_map, pipeline_mode=pl.Buffered(1)),
            pl.BlockSpec((H, Lp), const_map, pipeline_mode=pl.Buffered(1)),
            pl.BlockSpec((1, Lp), const_map, pipeline_mode=pl.Buffered(1)),
        ],
        out_specs=pl.BlockSpec((3, bt), lambda i: (0, i)),
        compiler_params=pltpu.CompilerParams(
            dimension_semantics=("parallel",),
            vmem_limit_bytes=vmem_limit),
    )(cls_hidden, gt_col, w_pool, bp, w1p, b1p)

    nll = packed[0]                               # (B,)
    probs = packed[1]                             # (B,)
    preds = packed[2].astype(jnp.int32)           # (B,)
    loss = jnp.sum(nll) / B
    return loss, preds, probs


def _reference(cls_hidden, w_pool, b_pool, w1, b1, ground_truth):
    f32 = jnp.float32
    pooler = jnp.tanh(cls_hidden.astype(f32) @ w_pool.astype(f32)
                      + b_pool.astype(f32))
    pooler = pooler.astype(w1.dtype).astype(f32)
    y1 = pooler @ w1.astype(f32) + b1.astype(f32)
    lsm = jax.nn.log_softmax(y1, axis=1)
    sm = jax.nn.softmax(y1, axis=1)
    probs = jnp.max(sm, axis=1)
    preds = jnp.argmax(y1, axis=1).astype(jnp.int32)
    loss = -jnp.mean(jnp.take_along_axis(lsm, ground_truth[:, None], axis=1))
    return loss, preds, probs


if __name__ == "__main__":
    # Small synthetic FCBERT config: batch=32, hidden=128, labels=8.
    B, H, L = 32, 128, 8
    key = jax.random.PRNGKey(0)
    k_cls, k_wp, k_bp, k_w1, k_b1, k_gt = jax.random.split(key, 6)

    # bf16 activations / weights (what an upstream bf16 encoder produces),
    # f32 biases; accumulation inside the kernel is f32.
    cls_hidden = jax.random.normal(k_cls, (B, H), jnp.float32).astype(jnp.bfloat16)
    w_pool = (jax.random.normal(k_wp, (H, H), jnp.float32) * 0.05).astype(jnp.bfloat16)
    b_pool = jax.random.normal(k_bp, (H,), jnp.float32) * 0.05
    w1 = (jax.random.normal(k_w1, (H, L), jnp.float32) * 0.05).astype(jnp.bfloat16)
    b1 = jax.random.normal(k_b1, (L,), jnp.float32) * 0.05
    ground_truth = jax.random.randint(k_gt, (B,), 0, L, dtype=jnp.int32)

    fwd = jax.jit(functools.partial(fcbert_forward))
    loss, preds, probs = fwd(cls_hidden, w_pool, b_pool, w1, b1, ground_truth)
    jax.block_until_ready((loss, preds, probs))

    ref_loss, ref_preds, ref_probs = _reference(
        cls_hidden, w_pool, b_pool, w1, b1, ground_truth)
    assert jnp.allclose(loss, ref_loss, atol=2e-3, rtol=2e-3), (loss, ref_loss)
    assert jnp.allclose(probs, ref_probs, atol=2e-3, rtol=2e-3)
    assert jnp.array_equal(preds, ref_preds)

    print("KERNEL_OK")
</pallas_src>

<mosaic_0001>
module attributes {stable_mosaic.version = 11 : i64} {
  func.func @fcbert_head_kernel(%arg0: i32, %arg1: memref<32x128xbf16, #tpu.memory_space<vmem>>, %arg2: memref<32x1xi32, #tpu.memory_space<vmem>>, %arg3: memref<128x128xbf16, #tpu.memory_space<vmem>>, %arg4: memref<1x128xf32, #tpu.memory_space<vmem>>, %arg5: memref<128x128xbf16, #tpu.memory_space<vmem>>, %arg6: memref<1x128xf32, #tpu.memory_space<vmem>>, %arg7: memref<3x32xf32, #tpu.memory_space<vmem>>) attributes {dimension_semantics = [#tpu.dimension_semantics<parallel>], iteration_bounds = array<i64: 1>, scalar_prefetch = 0 : i64, scratch_operands = 0 : i64, tpu.core_type = #tpu.core_type<tc>, window_params = [{transform_indices = @transform_0, window_bounds = array<i64: 32, 128>}, {transform_indices = @transform_1, window_bounds = array<i64: 32, 1>}, {pipeline_mode = #tpu.pipeline_mode<synchronous>, transform_indices = @transform_2, window_bounds = array<i64: 128, 128>}, {pipeline_mode = #tpu.pipeline_mode<synchronous>, transform_indices = @transform_3, window_bounds = array<i64: 1, 128>}, {pipeline_mode = #tpu.pipeline_mode<synchronous>, transform_indices = @transform_4, window_bounds = array<i64: 128, 128>}, {pipeline_mode = #tpu.pipeline_mode<synchronous>, transform_indices = @transform_5, window_bounds = array<i64: 1, 128>}, {transform_indices = @transform_6, window_bounds = array<i64: 3, 32>}]} {
    %c0 = arith.constant 0 : index
    %c0_0 = arith.constant 0 : index
    %0 = vector.load %arg1[%c0, %c0_0] : memref<32x128xbf16, #tpu.memory_space<vmem>>, vector<32x128xbf16>
    %c0_1 = arith.constant 0 : index
    %c0_2 = arith.constant 0 : index
    %1 = vector.load %arg3[%c0_1, %c0_2] : memref<128x128xbf16, #tpu.memory_space<vmem>>, vector<128x128xbf16>
    %cst = arith.constant dense<0.000000e+00> : vector<32x128xf32>
    %2 = tpu.matmul %0, %1, %cst {dimension_numbers = #tpu.dot_dimension_numbers<[1], [0], [0], [1], [0, 0, 1, 1], [], []>} : vector<32x128xbf16>, vector<128x128xbf16>, vector<32x128xf32> -> vector<32x128xf32>
    %c0_3 = arith.constant 0 : index
    %c0_4 = arith.constant 0 : index
    %3 = vector.load %arg4[%c0_3, %c0_4] : memref<1x128xf32, #tpu.memory_space<vmem>>, vector<1x128xf32>
    %4 = vector.broadcast %3 : vector<1x128xf32> to vector<32x128xf32>
    %5 = arith.addf %2, %4 : vector<32x128xf32>
    %6 = math.tanh %5 : vector<32x128xf32>
    %7 = arith.truncf %6 : vector<32x128xf32> to vector<32x128xbf16>
    %c0_5 = arith.constant 0 : index
    %c0_6 = arith.constant 0 : index
    %8 = vector.load %arg5[%c0_5, %c0_6] : memref<128x128xbf16, #tpu.memory_space<vmem>>, vector<128x128xbf16>
    %cst_7 = arith.constant dense<0.000000e+00> : vector<32x128xf32>
    %9 = tpu.matmul %7, %8, %cst_7 {dimension_numbers = #tpu.dot_dimension_numbers<[1], [0], [0], [1], [0, 0, 1, 1], [], []>} : vector<32x128xbf16>, vector<128x128xbf16>, vector<32x128xf32> -> vector<32x128xf32>
    %c0_8 = arith.constant 0 : index
    %c0_9 = arith.constant 0 : index
    %10 = vector.load %arg6[%c0_8, %c0_9] : memref<1x128xf32, #tpu.memory_space<vmem>>, vector<1x128xf32>
    %11 = vector.broadcast %10 : vector<1x128xf32> to vector<32x128xf32>
    %12 = arith.addf %9, %11 : vector<32x128xf32>
    %cst_10 = arith.constant dense<0xFF800000> : vector<32xf32>
    %13 = vector.multi_reduction <maximumf>, %12, %cst_10 [1] : vector<32x128xf32> to vector<32xf32>
    %14 = vector.shape_cast %13 : vector<32xf32> to vector<32x1xf32>
    %15 = vector.broadcast %14 : vector<32x1xf32> to vector<32x128xf32>
    %16 = arith.subf %12, %15 : vector<32x128xf32>
    %17 = math.exp %16 : vector<32x128xf32>
    %cst_11 = arith.constant dense<0.000000e+00> : vector<32xf32>
    %18 = vector.multi_reduction <add>, %17, %cst_11 [1] : vector<32x128xf32> to vector<32xf32>
    %19 = math.log %18 : vector<32xf32>
    %20 = tpu.reciprocal %18 {approx = true} : vector<32xf32> -> vector<32xf32>
    %21 = tpu.iota {dimensions = array<i32: 1>} : vector<32x128xi32>
    %22 = vector.broadcast %14 : vector<32x1xf32> to vector<32x128xf32>
    %23 = arith.cmpf oge, %12, %22 : vector<32x128xf32>
    %c128_i32 = arith.constant 128 : i32
    %24 = vector.broadcast %c128_i32 : i32 to vector<32x128xi32>
    %25 = arith.select %23, %21, %24 : vector<32x128xi1>, vector<32x128xi32>
    %cst_12 = arith.constant dense<2147483647> : vector<32xi32>
    %26 = vector.multi_reduction <minsi>, %25, %cst_12 [1] : vector<32x128xi32> to vector<32xi32>
    %c0_13 = arith.constant 0 : index
    %c0_14 = arith.constant 0 : index
    %27 = vector.load %arg2[%c0_13, %c0_14] : memref<32x1xi32, #tpu.memory_space<vmem>>, vector<32x1xi32>
    %28 = vector.broadcast %27 : vector<32x1xi32> to vector<32x128xi32>
    %29 = arith.cmpi eq, %21, %28 : vector<32x128xi32>
    %cst_15 = arith.constant 0.000000e+00 : f32
    %30 = vector.broadcast %cst_15 : f32 to vector<32x128xf32>
    %31 = arith.select %29, %16, %30 : vector<32x128xi1>, vector<32x128xf32>
    %cst_16 = arith.constant dense<0.000000e+00> : vector<32xf32>
    %32 = vector.multi_reduction <add>, %31, %cst_16 [1] : vector<32x128xf32> to vector<32xf32>
    %33 = arith.subf %19, %32 : vector<32xf32>
    %c0_17 = arith.constant 0 : index
    %c0_18 = arith.constant 0 : index
    %34 = vector.load %arg7[%c0_17, %c0_18] : memref<3x32xf32, #tpu.memory_space<vmem>>, vector<1x32xf32>
    %35 = vector.shape_cast %34 : vector<1x32xf32> to vector<32xf32>
    %36 = vector.shape_cast %33 : vector<32xf32> to vector<1x32xf32>
    tpu.vector_store %arg7[%c0_17, %c0_18], %36 {strides = array<i32>} : memref<3x32xf32, #tpu.memory_space<vmem>>, vector<1x32xf32>,
    %c1 = arith.constant 1 : index
    %c0_19 = arith.constant 0 : index
    %37 = vector.load %arg7[%c1, %c0_19] : memref<3x32xf32, #tpu.memory_space<vmem>>, vector<1x32xf32>
    %38 = vector.shape_cast %37 : vector<1x32xf32> to vector<32xf32>
    %39 = vector.shape_cast %20 : vector<32xf32> to vector<1x32xf32>
    tpu.vector_store %arg7[%c1, %c0_19], %39 {strides = array<i32>} : memref<3x32xf32, #tpu.memory_space<vmem>>, vector<1x32xf32>,
    %40 = arith.sitofp %26 : vector<32xi32> to vector<32xf32>
    %c2 = arith.constant 2 : index
    %c0_20 = arith.constant 0 : index
    %41 = vector.load %arg7[%c2, %c0_20] : memref<3x32xf32, #tpu.memory_space<vmem>>, vector<1x32xf32>
    %42 = vector.shape_cast %41 : vector<1x32xf32> to vector<32xf32>
    %43 = vector.shape_cast %40 : vector<32xf32> to vector<1x32xf32>
    tpu.vector_store %arg7[%c2, %c0_20], %43 {strides = array<i32>} : memref<3x32xf32, #tpu.memory_space<vmem>>, vector<1x32xf32>,
    return
  }
  func.func @transform_0(%arg0: i32) -> (i32, i32) {
    %c0_i32 = arith.constant 0 : i32
    %c0_i32_0 = arith.constant 0 : i32
    return %arg0, %c0_i32 : i32, i32
  }
  func.func @transform_1(%arg0: i32) -> (i32, i32) {
    %c0_i32 = arith.constant 0 : i32
    %c0_i32_0 = arith.constant 0 : i32
    return %arg0, %c0_i32 : i32, i32
  }
  func.func @transform_2(%arg0: i32) -> (i32, i32) {
    %c0_i32 = arith.constant 0 : i32
    %c0_i32_0 = arith.constant 0 : i32
    %c0_i32_1 = arith.constant 0 : i32
    return %c0_i32, %c0_i32_0 : i32, i32
  }
  func.func @transform_3(%arg0: i32) -> (i32, i32) {
    %c0_i32 = arith.constant 0 : i32
    %c0_i32_0 = arith.constant 0 : i32
    %c0_i32_1 = arith.constant 0 : i32
    return %c0_i32, %c0_i32_0 : i32, i32
  }
  func.func @transform_4(%arg0: i32) -> (i32, i32) {
    %c0_i32 = arith.constant 0 : i32
    %c0_i32_0 = arith.constant 0 : i32
    %c0_i32_1 = arith.constant 0 : i32
    return %c0_i32, %c0_i32_0 : i32, i32
  }
  func.func @transform_5(%arg0: i32) -> (i32, i32) {
    %c0_i32 = arith.constant 0 : i32
    %c0_i32_0 = arith.constant 0 : i32
    %c0_i32_1 = arith.constant 0 : i32
    return %c0_i32, %c0_i32_0 : i32, i32
  }
  func.func @transform_6(%arg0: i32) -> (i32, i32) {
    %c0_i32 = arith.constant 0 : i32
    %c0_i32_0 = arith.constant 0 : i32
    return %c0_i32, %arg0 : i32, i32
  }
}

</mosaic_0001>

<bundles_post_ra>
// kernel: fcbert_forward.1
= control target key start
LH: loop header
LB: loop body
LE: loop exit
PB: predicated region body
PF: predicated region fallthrough
CT: control target
= control target key end

     0   :  { %v651_v33 = vmov 0   ;;  %v326_v45 = vlaneseq  ;;  %vm441_vm12 = vcmask 130112   ;;  %vm448_vm13 = vcmask 195712   ;;  %s835_s2 = inlined_call_operand.vmem [shape: bf16[128,128], index: 2, kind: input, shape index: {}]   ;;  %s836_s0 = inlined_call_operand.vmem [shape: bf16[32,128], index: 0, kind: input, shape index: {}]   ;;  %s837_s4 = inlined_call_operand.vmem [shape: bf16[128,128], index: 4, kind: input, shape index: {}]   ;;  %s838_s3 = inlined_call_operand.vmem [shape: f32[1,128], index: 3, kind: input, shape index: {}]   ;;  %s839_s5 = inlined_call_operand.vmem [shape: f32[1,128], index: 5, kind: input, shape index: {}]   ;;  %s840_s1 = inlined_call_operand.vmem [shape: s32[32,1], index: 1, kind: input, shape index: {}]   ;;  %s841_s6 = inlined_call_operand.vmem [shape: f32[3,32], index: 6, kind: output, shape index: {}]  }
   0x1   :  { %v601_v0 = vld [vmem:[%s835_s2] sm:$0xff]   ;;  %v602_v1 = vld [vmem:[%s835_s2 + $0x8] sm:$0xff]   ;;  %v603_v2 = vld [vmem:[%s835_s2 + $0x10] sm:$0xff]   ;;  %600 = vset.pattern.permute.xlu1 %v651_v33  ;;  %599 = vset.pattern.permute.xlu0 %v651_v33  ;;  %vm455_vm14 = vcmask 261312   ;;  %vm458_vm15 = vcmask 253952  }
   0x2   :  { %558 = vmatprep.subr.bf16.mxu0 %v601_v0  ;;  %v604_v3 = vld [vmem:[%s835_s2 + $0x18] sm:$0xff]   ;;  %v609_v4 = vld [vmem:[%s836_s0] sm:$0xff]   ;;  %v612_v7 = vld [vmem:[%s837_s4 + $0x8] sm:$0xff]   ;;  %v754_v46 = vand.u32 127, %v326_v45 }
   0x3   :  { %559 = vmatpush3.bf16.msra.mxu0 %v601_v0  ;;  %v605_v5 = vld [vmem:[%s835_s2 + $0x20] sm:$0xff]   ;;  %574 = vmatprep.mubr.bf16.mxu0 %v609_v4  ;;  %v613_v8 = vld [vmem:[%s837_s4 + $0x10] sm:$0xff]   ;;  %v606_v9 = vld [vmem:[%s835_s2 + $0x28] sm:$0xff]  }
   0x4   :  { %560 = vmatprep.subr.bf16.mxu0 %v602_v1  ;;  %v611_v6 = vld [vmem:[%s837_s4] sm:$0xff]   ;;  %v607_v10 = vld [vmem:[%s835_s2 + $0x30] sm:$0xff]   ;;  %v608_v11 = vld [vmem:[%s835_s2 + $0x38] sm:$0xff]  }
   0x5   :  { %578 = vmatprep.subr.bf16.mxu1 %v611_v6  ;;  %v610_v12 = vld [vmem:[%s836_s0 + $0x8] sm:$0xff]   ;;  %v614_v13 = vld [vmem:[%s837_s4 + $0x18] sm:$0xff]   ;;  %v615_v14 = vld [vmem:[%s837_s4 + $0x20] sm:$0xff]  }
   0x6   :  { %579 = vmatpush3.bf16.msra.mxu1 %v611_v6  ;;  %v616_v15 = vld [vmem:[%s837_s4 + $0x28] sm:$0xff]   ;;  %v617_v16 = vld [vmem:[%s837_s4 + $0x30] sm:$0xff]   ;;  %v618_v17 = vld [vmem:[%s837_s4 + $0x38] sm:$0xff]  }
   0x7   :  { %561 = vmatpush3.bf16.msra.mxu0 %v602_v1  ;;  %580 = vmatprep.subr.bf16.mxu1 %v612_v7  ;;  %v518_v18 = vld [vmem:[%s838_s3] ss:$0 sm:$0xff]  ;;  %v393_v43 = vld [vmem:[%s840_s1 + $0x8] sm:$0xff]  ;;  %v394_v44 = vld [vmem:[%s840_s1 + $0x10] sm:$0xff] }
   0x8   :  { %562 = vmatprep.subr.bf16.mxu0 %v603_v2  ;;  %v529_v34 = vld [vmem:[%s839_s5] ss:$0 sm:$0xff]  ;;  %v395_v63 = vld [vmem:[%s840_s1 + $0x18] sm:$0xff] }
   0x9   :  { %v392_v0 = vld [vmem:[%s840_s1] sm:$0xff] }
   0xa   :  { %581 = vmatpush3.bf16.msra.mxu1 %v612_v7 }
   0xb   :  { %563 = vmatpush3.bf16.msra.mxu0 %v603_v2  ;;  %582 = vmatprep.subr.bf16.mxu1 %v613_v8 }
   0xc   :  { %564 = vmatprep.subr.bf16.mxu0 %v604_v3 }
   0xe   :  { %583 = vmatpush3.bf16.msra.mxu1 %v613_v8 }
   0xf   :  { %565 = vmatpush3.bf16.msra.mxu0 %v604_v3  ;;  %584 = vmatprep.subr.bf16.mxu1 %v614_v13 }
  0x10   :  { %566 = vmatprep.subr.bf16.mxu0 %v605_v5 }
  0x12   :  { %585 = vmatpush3.bf16.msra.mxu1 %v614_v13 }
  0x13   :  { %567 = vmatpush3.bf16.msra.mxu0 %v605_v5  ;;  %586 = vmatprep.subr.bf16.mxu1 %v615_v14 }
  0x14   :  { %568 = vmatprep.subr.bf16.mxu0 %v606_v9 }
  0x16   :  { %587 = vmatpush3.bf16.msra.mxu1 %v615_v14 }
  0x17   :  { %569 = vmatpush3.bf16.msra.mxu0 %v606_v9  ;;  %588 = vmatprep.subr.bf16.mxu1 %v616_v15 }
  0x18   :  { %570 = vmatprep.subr.bf16.mxu0 %v607_v10 }
  0x1a   :  { %589 = vmatpush3.bf16.msra.mxu1 %v616_v15 }
  0x1b   :  { %571 = vmatpush3.bf16.msra.mxu0 %v607_v10  ;;  %590 = vmatprep.subr.bf16.mxu1 %v617_v16 }
  0x1c   :  { %572 = vmatprep.subr.bf16.mxu0 %v608_v11 }
  0x1e   :  { %591 = vmatpush3.bf16.msra.mxu1 %v617_v16 }
  0x1f   :  { %573 = vmatpush3.bf16.msra.mxu0 %v608_v11  ;;  %592 = vmatprep.subr.bf16.mxu1 %v618_v17 }
  0x22   :  { %575 = vmatmul.mubr.bf16.vlgmr.msra.gmra.mrb[0].mxu0 %v610_v12  ;;  %593 = vmatpush3.bf16.msra.mxu1 %v618_v17 }
  0xf5   :  { %v576_v19 = vpop.f32.mrb[0].mxu0 }
  0xf6   :  { %v154_v20 = vadd.f32 %v576_v19, %v518_v18  ;;  %v145_v21 = vpop.f32.mrb[1].mxu0 }
  0xf7   :  { %v146_v22 = vadd.f32 %v518_v18, %v145_v21  ;;  %v577_v23 = vpop.f32.mrb[2].mxu0 }
  0xf8   :  { %619 = vtanh.f32 %v154_v20  ;;  %v157_v24 = vadd.f32 %v577_v23, %v518_v18  ;;  %v148_v25 = vpop.f32.mrb[3].mxu0 }
  0xf9   :  { %621 = vtanh.f32 %v146_v22  ;;  %v149_v26 = vadd.f32 %v518_v18, %v148_v25 }
  0xfa   :  { %623 = vtanh.f32 %v157_v24 }
  0xfb   :  { %625 = vtanh.f32 %v149_v26 }
 0x102   :  { %v620_v27 = vpop.eup %619 }
 0x103   :  { %v622_v28 = vpop.eup %621 }
 0x104   :  { %v624_v29 = vpop.eup %623 }
 0x105   :  { %v626_v30 = vpop.eup %625  ;;  %v165_v31 = vpack.c.bf16 %v624_v29, %v620_v27 }
 0x106   :  { %v164_v32 = vpack.c.bf16 %v626_v30, %v622_v28 }
 0x108   :  { %594 = vmatprep.mubr.bf16.mxu1 %v164_v32 }
 0x109   :  { %595 = vmatmul.mubr.bf16.vlgmr.msra.gmra.mrb[0].mxu1 %v165_v31 }
 0x1dc   :  { %v596_v35 = vpop.f32.mrb[0].mxu1 }
 0x1dd   :  { %v280_v36 = vadd.f32 %v596_v35, %v529_v34  ;;  %v271_v37 = vpop.f32.mrb[1].mxu1 }
 0x1de   :  { %v272_v38 = vadd.f32 %v529_v34, %v271_v37  ;;  %v597_v39 = vpop.f32.mrb[2].mxu1 }
 0x1df   :  { %290 = vmax.xlane.f32.xlu1 %v280_v36  ;;  %v274_v40 = vpop.f32.mrb[3].mxu1  ;;  %v283_v41 = vadd.f32 %v597_v39, %v529_v34 }
 0x1e0   :  { %286 = vmax.xlane.f32.xlu0 %v272_v38  ;;  %v275_v42 = vadd.f32 %v529_v34, %v274_v40 }
 0x1e3   :  { %292 = vmax.xlane.f32.xlu1 %v283_v41 }
 0x1e4   :  { %288 = vmax.xlane.f32.xlu0 %v275_v42 }
 0x1f4   :  { %400 = vperm.xlu1 %600, %v393_v43   ;;  %v436_v43 = vadd.s32 4294967288, %v754_v46 }
 0x1f8   :  { %403 = vperm.xlu1 %600, %v394_v44  }
 0x26c   :  { %v291_v47 = vpop.xlane.xlu1 %290 }
 0x26d   :  { %vm330_vm0 = vcmp.ge.f32.partialorder %v280_v36, %v291_v47  ;;  %v287_v48 = vpop.xlane.xlu0 %286  ;;  %v296_v4 = vsub.f32 %v280_v36, %v291_v47  ;;  %v450_v47 = vadd.s32 4294967272, %v754_v46 }
 0x26e   :  { %v757_v49 = vsel %vm330_vm0, %v754_v46, 128  ;;  %vm328_vm1 = vcmp.ge.f32.partialorder %v272_v38, %v287_v48  ;;  %v294_v2 = vsub.f32 %v272_v38, %v287_v48 }
 0x26f   :  { %v332_v50 = vsel %vm328_vm1, %v754_v46, 128  ;;  %v365_v51 = vshra.s32 %v757_v49, 16  ;;  %v302_v6 = vmul.f32 1.442695, %v296_v4  ;;  %v364_v28 = vand.u32 65535, %v757_v49 }
 0x270   :  { %v293_v52 = vpop.xlane.xlu1 %292  ;;  %v337_v55 = vshra.s32 %v332_v50, 16  ;;  %v298_v5 = vmul.f32 1.442695, %v294_v2  ;;  %v336_v16 = vand.u32 65535, %v332_v50 }
 0x271   :  { %vm331_vm2 = vcmp.ge.f32.partialorder %v283_v41, %v293_v52  ;;  %v289_v53 = vpop.xlane.xlu0 %288  ;;  %v761_v54 = vcvt.s32.f32 %v365_v51  ;;  %v297_v7 = vsub.f32 %v283_v41, %v293_v52  ;;  %v366_v32 = vcvt.s32.f32 %v364_v28 }
 0x272   :  { %v335_v56 = vsel %vm331_vm2, %v754_v46, 128  ;;  %vm329_vm3 = vcmp.ge.f32.partialorder %v275_v42, %v289_v53  ;;  %v339_v60 = vcvt.s32.f32 %v337_v55  ;;  %v295_v1 = vsub.f32 %v275_v42, %v289_v53 }
 0x273   :  { %v333_v57 = vsel %vm329_vm3, %v754_v46, 128  ;;  %368 = vmin.xlane.f32.xlu0 %v761_v54  ;;  %v379_v58 = vshra.s32 %v335_v56, 16  ;;  %v304_v8 = vmul.f32 1.442695, %v297_v7  ;;  %v338_v19 = vcvt.s32.f32 %v336_v16 }
 0x274   :  { %v351_v61 = vshra.s32 %v333_v57, 16  ;;  %v300_v3 = vmul.f32 1.442695, %v295_v1  ;;  %v401_v13 = vpop.permute.xlu1 %400  ;;  %v378_v20 = vand.u32 65535, %v335_v56  ;;  %v350_v24 = vand.u32 65535, %v333_v57 }
 0x275   :  { %v381_v59 = vcvt.s32.f32 %v379_v58  ;;  %vm409_vm8 = vcmp.eq.s32.totalorder %v754_v46, %v401_v13  ;;  %v443_v41 = vadd.s32 4294967280, %v754_v46  ;;  %v433_v42 = vshrl.u32 %v326_v45, 7 }
 0x276   :  { %v353_v62 = vcvt.s32.f32 %v351_v61  ;;  %627 = vpow2.f32 %v300_v3  ;;  %v380_v23 = vcvt.s32.f32 %v378_v20  ;;  %v352_v27 = vcvt.s32.f32 %v350_v24 }
 0x277   :  { %382 = vmin.xlane.f32.xlu1 %v381_v59  ;;  %340 = vmin.xlane.f32.xlu0 %v339_v60  ;;  %629 = vpow2.f32 %v298_v5  ;;  %v413_v33 = vsel %vm409_vm8, %v295_v1, 0.0  ;;  %v794_v44 = vsub.s32 %v754_v46, %v433_v42  ;;  %v797_v49 = vsub.s32 %v443_v41, %v433_v42 }
 0x278   :  { %631 = vpow2.f32 %v302_v6  ;;  %v404_v14 = vpop.permute.xlu1 %403  ;;  %v439_v51 = vsub.s32 %v436_v43, %v433_v42 }
 0x279   :  { %633 = vpow2.f32 %v304_v8  ;;  %vm410_vm10 = vcmp.eq.s32.totalorder %v754_v46, %v404_v14 }
 0x27a   :  { %v414_v36 = vsel %vm410_vm10, %v296_v4, 0.0 }
 0x27b   :  { %354 = vmin.xlane.f32.xlu1 %v353_v62 }
 0x280   :  { %v628_v9 = vpop.eup %627 }
 0x281   :  { %v630_v10 = vpop.eup %629 }
 0x282   :  { %v632_v11 = vpop.eup %631 }
 0x283   :  { %v634_v12 = vpop.eup %633 }
 0x28c   :  { %406 = vperm.xlu1 %600, %v395_v63  }
 0x28d   :  { %397 = vperm.xlu0 %599, %v392_v0  }
 0x2ac   :  { %308 = vadd.xlane.f32.xlu0 %v628_v9 }
 0x2b0   :  { %306 = vadd.xlane.f32.xlu1 %v630_v10 }
 0x2b4   :  { %310 = vadd.xlane.f32.xlu1 %v632_v11 }
 0x2b8   :  { %312 = vadd.xlane.f32.xlu1 %v634_v12 }
 0x300   :  { %v772_v15 = vpop.xlane.xlu0 %368 }
 0x301   :  { %vm370_vm9 = vcmp.eq.f32.partialorder %v761_v54, %v772_v15  ;;  %v800_v54 = vsub.s32 %v450_v47, %v433_v42  ;;  %v375_v5 = vcvt.f32.s32 %v772_v15 }
 0x302   :  { %v371_v34 = vsel %vm370_vm9, %v366_v32, inf }
 0x304   :  { %v774_v17 = vpop.xlane.xlu1 %382  ;;  %v776_v18 = vpop.xlane.xlu0 %340 }
 0x305   :  { %vm342_vm4 = vcmp.eq.f32.partialorder %v339_v60, %v776_v18  ;;  %vm384_vm5 = vcmp.eq.f32.partialorder %v381_v59, %v774_v17  ;;  %v347_v61 = vcvt.f32.s32 %v776_v18 }
 0x306   :  { %v343_v21 = vsel %vm342_vm4, %v338_v19, inf  ;;  %v385_v25 = vsel %vm384_vm5, %v380_v23, inf  ;;  %v376_v19 = vshll.u32 %v375_v5, 16 }
 0x307   :  { %344 = vmin.xlane.f32.xlu1 %v343_v21  ;;  %v348_v0 = vshll.u32 %v347_v61, 16 }
 0x308   :  { %v780_v22 = vpop.xlane.xlu1 %354 }
 0x309   :  { %vm356_vm6 = vcmp.eq.f32.partialorder %v353_v62, %v780_v22  ;;  %v361_v1 = vcvt.f32.s32 %v780_v22 }
 0x30a   :  { %v357_v29 = vsel %vm356_vm6, %v352_v27, inf }
 0x30b   :  { %386 = vmin.xlane.f32.xlu1 %v385_v25  ;;  %v362_v9 = vshll.u32 %v361_v1, 16 }
 0x30c   :  { %v398_v26 = vpop.permute.xlu0 %397  ;;  %v407_v31 = vpop.permute.xlu1 %406 }
 0x30d   :  { %vm408_vm7 = vcmp.eq.s32.totalorder %v754_v46, %v398_v26  ;;  %vm411_vm11 = vcmp.eq.s32.totalorder %v754_v46, %v407_v31 }
 0x30e   :  { %v412_v30 = vsel %vm408_vm7, %v294_v2, 0.0  ;;  %v415_v35 = vsel %vm411_vm11, %v297_v7, 0.0  ;;  %v389_v2 = vcvt.f32.s32 %v774_v17 }
 0x30f   :  { %358 = vmin.xlane.f32.xlu1 %v357_v29  ;;  %416 = vadd.xlane.f32.xlu0 %v412_v30 }
 0x310   :  { %v390_v12 = vshll.u32 %v389_v2, 16 }
 0x313   :  { %418 = vadd.xlane.f32.xlu1 %v413_v33  ;;  %372 = vmin.xlane.f32.xlu0 %v371_v34 }
 0x317   :  { %422 = vadd.xlane.f32.xlu1 %v415_v35  ;;  %420 = vadd.xlane.f32.xlu0 %v414_v36 }
 0x339   :  { %v309_v38 = vpop.xlane.xlu0 %308 }
 0x33d   :  { %v307_v37 = vpop.xlane.xlu1 %306 }
 0x33e   :  { %635 = vrcp.f32 %v307_v37 }
 0x33f   :  { %637 = vrcp.f32 %v309_v38 }
 0x341   :  { %v311_v39 = vpop.xlane.xlu1 %310 }
 0x342   :  { %639 = vrcp.f32 %v311_v39 }
 0x345   :  { %v313_v40 = vpop.xlane.xlu1 %312 }
 0x346   :  { %641 = vrcp.f32 %v313_v40 }
 0x347   :  { %643 = vlog2.f32 %v309_v38 }
 0x348   :  { %v636_v48 = vpop.eup %635  ;;  %645 = vlog2.f32 %v307_v37 }
 0x349   :  { %v638_v50 = vpop.eup %637  ;;  %v467_v53 = vrot.slane %v636_v48, %v794_v44  ;;  %647 = vlog2.f32 %v313_v40 }
 0x34a   :  { %v471_v55 = vrot.slane %v638_v50, %v439_v51  ;;  %649 = vlog2.f32 %v311_v39 }
 0x34c   :  { %v640_v52 = vpop.eup %639  ;;  %v472_v46 = vsel %vm441_vm12, %v471_v55, %v467_v53 }
 0x34d   :  { %v476_v45 = vrot.slane %v640_v52, %v797_v49 }
 0x34f   :  { %v477_v58 = vsel %vm448_vm13, %v476_v45, %v472_v46 }
 0x350   :  { %v642_v56 = vpop.eup %641 }
 0x351   :  { %v481_v57 = vrot.slane %v642_v56, %v800_v54  ;;  %v644_v4 = vpop.eup %643 }
 0x352   :  { %v646_v11 = vpop.eup %645  ;;  %v317_v18 = vmul.f32 0.6931472, %v644_v4 }
 0x353   :  { %v482_v59 = vsel %vm455_vm14, %v481_v57, %v477_v58  ;;  %v648_v13 = vpop.eup %647  ;;  %v315_v24 = vmul.f32 0.6931472, %v646_v11 }
 0x354   :  { %484 = vst.msk [vmem:[%s841_s6 + $0x1] sm:$0x1] %vm458_vm15, %v482_v59  ;;  %v650_v17 = vpop.eup %649  ;;  %v321_v26 = vmul.f32 0.6931472, %v648_v13 }
 0x355   :  { %v319_v33 = vmul.f32 0.6931472, %v650_v17 }
 0x394   :  { %v345_v60 = vpop.xlane.xlu1 %344 }
 0x395   :  { %v346_v62 = vcvt.f32.s32 %v345_v60 }
 0x397   :  { %v349_v3 = vadd.s32 %v348_v0, %v346_v62 }
 0x398   :  { %v387_v63 = vpop.xlane.xlu1 %386 }
 0x399   :  { %v388_v6 = vcvt.f32.s32 %v387_v63  ;;  %v485_v14 = vcvt.s32.f32 %v349_v3 }
 0x39b   :  { %v391_v20 = vadd.s32 %v390_v12, %v388_v6  ;;  %v496_v27 = vrot.slane %v485_v14, %v794_v44 }
 0x39c   :  { %v359_v7 = vpop.xlane.xlu1 %358  ;;  %v417_v8 = vpop.xlane.xlu0 %416 }
 0x39d   :  { %v360_v10 = vcvt.f32.s32 %v359_v7  ;;  %v424_v29 = vsub.f32 %v315_v24, %v417_v8  ;;  %v488_v31 = vcvt.s32.f32 %v391_v20 }
 0x39f   :  { %v363_v16 = vadd.s32 %v362_v9, %v360_v10  ;;  %v435_v40 = vrot.slane %v424_v29, %v794_v44  ;;  %v510_v43 = vrot.slane %v488_v31, %v800_v54 }
 0x3a0   :  { %v419_v21 = vpop.xlane.xlu1 %418  ;;  %v373_v22 = vpop.xlane.xlu0 %372 }
 0x3a1   :  { %v486_v23 = vcvt.s32.f32 %v363_v16  ;;  %v425_v25 = vsub.f32 %v317_v18, %v419_v21  ;;  %v374_v15 = vcvt.f32.s32 %v373_v22 }
 0x3a3   :  { %v500_v28 = vrot.slane %v486_v23, %v439_v51  ;;  %v377_v30 = vadd.s32 %v376_v19, %v374_v15  ;;  %v440_v36 = vrot.slane %v425_v25, %v439_v51 }
 0x3a4   :  { %v423_v32 = vpop.xlane.xlu1 %422  ;;  %v421_v34 = vpop.xlane.xlu0 %420 }
 0x3a5   :  { %v501_v35 = vsel %vm441_vm12, %v500_v28, %v496_v27  ;;  %v487_v37 = vcvt.s32.f32 %v377_v30  ;;  %v427_v38 = vsub.f32 %v321_v26, %v423_v32  ;;  %v426_v39 = vsub.f32 %v319_v33, %v421_v34 }
 0x3a6   :  { %v442_v48 = vsel %vm441_vm12, %v440_v36, %v435_v40 }
 0x3a7   :  { %v505_v41 = vrot.slane %v487_v37, %v797_v49  ;;  %v454_v42 = vrot.slane %v427_v38, %v800_v54  ;;  %v447_v47 = vrot.slane %v426_v39, %v797_v49 }
 0x3a9   :  { %v506_v50 = vsel %vm448_vm13, %v505_v41, %v501_v35  ;;  %v449_v51 = vsel %vm448_vm13, %v447_v47, %v442_v48 }
 0x3aa   :  { %v511_v52 = vsel %vm455_vm14, %v510_v43, %v506_v50  ;;  %v456_v44 = vsel %vm455_vm14, %v454_v42, %v449_v51 }
 0x3ab   :  { %513 = vst.msk [vmem:[%s841_s6 + $0x2] sm:$0x1] %vm458_vm15, %v511_v52  ;;  %459 = vst.msk [vmem:[%s841_s6] sm:$0x1] %vm458_vm15, %v456_v44 }

</bundles_post_ra>
